<compile_context>
chip_gen: v7x
topology: tpu7x:2x2x1
jax: 0.10.0
libtpu: 0.0.40
codegen_flags: <defaults>
</compile_context>

<pallas_src>
import functools
import math

import jax
import jax.numpy as jnp
import numpy as np
from jax.experimental import pallas as pl
from jax.experimental.pallas import tpu as pltpu

# torchvision GaussianBlur(kernel_size=3, sigma=1) separable 1-D weights:
#   k = exp(-0.5 * ([-1, 0, 1] / sigma)**2);  k /= k.sum()
_E = math.exp(-0.5)
W_EDGE = _E / (1.0 + 2.0 * _E)      # ~0.2740686
W_CENTER = 1.0 / (1.0 + 2.0 * _E)   # ~0.4518628


def _round_up(v, m):
    return (v + m - 1) // m * m


def _blur3x3_kernel(row_mask_ref, col_mask_ref, x_ref, o_ref, *, compute_dtype):
    """x_ref/o_ref: (rows_per_block, lanes); masks: (rows_per_block, 1) / (1, lanes).

    Mask values are +1 on an image's first row/col, -1 on its last, 0 elsewhere,
    so `a + b + (b - a) * mask` yields (a+b) inside, 2b at the first edge and 2a
    at the last edge — exactly the reflect-padded 3-tap neighbor sum.
    """
    x = x_ref[...].astype(compute_dtype)
    rows, lanes = x.shape
    rmask = row_mask_ref[...]
    cmask = col_mask_ref[...]

    # vertical 3-tap pass (sublane axis); circular roll + mask edge fixup
    up = pltpu.roll(x, shift=1, axis=0)            # x[r-1]
    dn = pltpu.roll(x, shift=rows - 1, axis=0)     # x[r+1]
    y = W_EDGE * (up + dn + (dn - up) * rmask) + W_CENTER * x

    # horizontal 3-tap pass (lane axis)
    lf = pltpu.roll(y, shift=1, axis=1)            # y[c-1]
    rt = pltpu.roll(y, shift=lanes - 1, axis=1)    # y[c+1]
    z = W_EDGE * (lf + rt + (rt - lf) * cmask) + W_CENTER * y

    o_ref[...] = z.astype(o_ref.dtype)


def gaussian_blur3x3(x, *, block_bytes=1 << 20, vmem_limit_bytes=32 * 1024 * 1024):
    """GaussianBlur(kernel_size=3, sigma=1) with reflect padding over NCHW `x`."""
    n, c, h, w = x.shape
    if h < 2 or w < 2:
        raise ValueError("reflect padding requires H >= 2 and W >= 2")
    nc = n * c
    in_dtype = x.dtype

    # bf16 math on bf16 inputs (v6e/v7x native); otherwise f32 (v5e-safe).
    if jnp.dtype(in_dtype) == jnp.dtype(jnp.bfloat16):
        compute_dtype = jnp.bfloat16
    else:
        compute_dtype = jnp.float32

    # ---- lane packing: g images side-by-side on the lane axis when W < 128 ----
    g = max(1, 128 // w) if w < 128 else 1
    lanes = _round_up(g * w, 128)
    n_groups = pl.cdiv(nc, g)

    # ---- choose groups per block (blocks are full and image-aligned) ----
    itembytes = max(jnp.dtype(in_dtype).itemsize, jnp.dtype(compute_dtype).itemsize)
    group_bytes = h * lanes * itembytes
    m = 8 // math.gcd(h, 8)                       # sublane alignment unit in groups
    target = max(1, block_bytes // max(group_bytes, 1))
    if n_groups >= 2:                             # keep >=2 grid steps (2 TCs on v7x)
        target = min(target, -(-n_groups // 2))
    gpb = min(target, n_groups)
    if gpb < n_groups:
        gpb = min(max(m, (gpb // m) * m), n_groups)   # 8-align rows_per_block
    if gpb < n_groups:
        n_groups = _round_up(n_groups, gpb)           # only full blocks (no OOB garbage)
    # TODO(synk): tile H with a +/-1-row halo for single images too large for one block.

    nc_pad = n_groups * g
    rows_total = n_groups * h
    rows_per_block = gpb * h
    grid = (n_groups // gpb,)

    # ---- pack to a lane-dense 2-D slab (rows_total, lanes) ----
    xi = x.reshape(nc, h, w)
    if nc_pad != nc:
        xi = jnp.pad(xi, ((0, nc_pad - nc), (0, 0), (0, 0)))
    if g > 1:
        xi = xi.reshape(n_groups, g, h, w).transpose(0, 2, 1, 3).reshape(n_groups, h, g * w)
    else:
        xi = xi.reshape(n_groups, h, w)
    if lanes != g * w:
        xi = jnp.pad(xi, ((0, 0), (0, 0), (0, lanes - g * w)))
    x2 = xi.reshape(rows_total, lanes)

    # ---- trace-time-constant reflect-boundary masks ----
    ridx = np.arange(rows_per_block) % h
    row_mask_np = ((ridx == 0).astype(np.float32) - (ridx == h - 1).astype(np.float32))[:, None]
    cidx = np.arange(lanes)
    col_mask_np = np.where(
        cidx < g * w,
        (cidx % w == 0).astype(np.float32) - (cidx % w == w - 1).astype(np.float32),
        0.0,
    )[None, :]
    row_mask = jnp.asarray(row_mask_np, dtype=compute_dtype)
    col_mask = jnp.asarray(col_mask_np, dtype=compute_dtype)

    kernel = functools.partial(_blur3x3_kernel, compute_dtype=compute_dtype)
    out2 = pl.pallas_call(
        kernel,
        out_shape=jax.ShapeDtypeStruct((rows_total, lanes), in_dtype),
        grid=grid,
        in_specs=[
            pl.BlockSpec((rows_per_block, 1), lambda i: (0, 0)),   # row mask (block-invariant)
            pl.BlockSpec((1, lanes), lambda i: (0, 0)),            # col mask (block-invariant)
            pl.BlockSpec((rows_per_block, lanes), lambda i: (i, 0)),
        ],
        out_specs=pl.BlockSpec((rows_per_block, lanes), lambda i: (i, 0)),
        compiler_params=pltpu.CompilerParams(
            dimension_semantics=("parallel",),
            vmem_limit_bytes=vmem_limit_bytes,
        ),
    )(row_mask, col_mask, x2)

    # ---- unpack back to NCHW ----
    out = out2.reshape(n_groups, h, lanes)
    if lanes != g * w:
        out = out[:, :, : g * w]
    if g > 1:
        out = out.reshape(n_groups, h, g, w).transpose(0, 2, 1, 3)
    out = out.reshape(nc_pad, h, w)
    if nc_pad != nc:
        out = out[:nc]
    return out.reshape(n, c, h, w)


class SimpleModel:
    """JAX/Pallas equivalent of the PyTorch SimpleModel (GaussianBlur(3, sigma=1))."""

    def __call__(self, x):
        return gaussian_blur3x3(x)


def _reference_blur(x):
    """Pure-JAX reference: separable 3-tap gaussian with reflect padding."""
    k0, k1 = W_CENTER, W_EDGE
    xf = x.astype(jnp.float32)
    xp = jnp.pad(xf, ((0, 0), (0, 0), (1, 1), (0, 0)), mode="reflect")
    y = k1 * xp[:, :, :-2, :] + k0 * xp[:, :, 1:-1, :] + k1 * xp[:, :, 2:, :]
    yp = jnp.pad(y, ((0, 0), (0, 0), (0, 0), (1, 1)), mode="reflect")
    z = k1 * yp[:, :, :, :-2] + k0 * yp[:, :, :, 1:-1] + k1 * yp[:, :, :, 2:]
    return z.astype(x.dtype)


if __name__ == "__main__":
    key = jax.random.PRNGKey(0)
    x = jax.random.normal(key, (2, 4, 16, 16), dtype=jnp.float32)

    model = SimpleModel()
    y = jax.block_until_ready(jax.jit(model.__call__)(x))

    y_ref = _reference_blur(x)
    max_err = float(jnp.max(jnp.abs(y.astype(jnp.float32) - y_ref.astype(jnp.float32))))
    tol = 1e-4 if x.dtype == jnp.float32 else 3e-2   # bf16 blur is ~1e-2 accurate
    if y.shape != x.shape or not (max_err < tol):
        raise SystemExit(f"mismatch: shape={y.shape}, max_abs_err={max_err}")
    print("KERNEL_OK")
</pallas_src>

<mosaic_0001>
module attributes {stable_mosaic.version = 11 : i64} {
  func.func @_blur3x3_kernel(%arg0: i32, %arg1: memref<16x1xf32, #tpu.memory_space<vmem>>, %arg2: memref<1x128xf32, #tpu.memory_space<vmem>>, %arg3: memref<16x128xf32, #tpu.memory_space<vmem>>, %arg4: memref<16x128xf32, #tpu.memory_space<vmem>>) attributes {dimension_semantics = [#tpu.dimension_semantics<parallel>], iteration_bounds = array<i64: 1>, scalar_prefetch = 0 : i64, scratch_operands = 0 : i64, tpu.core_type = #tpu.core_type<tc>, window_params = [{pipeline_mode = #tpu.pipeline_mode<synchronous>, transform_indices = @transform_0, window_bounds = array<i64: 16, 1>}, {pipeline_mode = #tpu.pipeline_mode<synchronous>, transform_indices = @transform_1, window_bounds = array<i64: 1, 128>}, {transform_indices = @transform_2, window_bounds = array<i64: 16, 128>}, {transform_indices = @transform_3, window_bounds = array<i64: 16, 128>}]} {
    %c0 = arith.constant 0 : index
    %c0_0 = arith.constant 0 : index
    %0 = vector.load %arg3[%c0, %c0_0] : memref<16x128xf32, #tpu.memory_space<vmem>>, vector<16x128xf32>
    %c0_1 = arith.constant 0 : index
    %c0_2 = arith.constant 0 : index
    %1 = vector.load %arg1[%c0_1, %c0_2] : memref<16x1xf32, #tpu.memory_space<vmem>>, vector<16x1xf32>
    %c0_3 = arith.constant 0 : index
    %c0_4 = arith.constant 0 : index
    %2 = vector.load %arg2[%c0_3, %c0_4] : memref<1x128xf32, #tpu.memory_space<vmem>>, vector<1x128xf32>
    %c1_i32 = arith.constant 1 : i32
    %3 = tpu.dynamic_rotate %0 by %c1_i32 dim 0 : vector<16x128xf32>, i32 -> vector<16x128xf32>
    %c15_i32 = arith.constant 15 : i32
    %4 = tpu.dynamic_rotate %0 by %c15_i32 dim 0 : vector<16x128xf32>, i32 -> vector<16x128xf32>
    %5 = arith.addf %3, %4 : vector<16x128xf32>
    %6 = arith.subf %4, %3 : vector<16x128xf32>
    %7 = vector.broadcast %1 : vector<16x1xf32> to vector<16x128xf32>
    %8 = arith.mulf %6, %7 : vector<16x128xf32>
    %9 = arith.addf %5, %8 : vector<16x128xf32>
    %cst = arith.constant 0.274068624 : f32
    %10 = vector.broadcast %cst : f32 to vector<16x128xf32>
    %11 = arith.mulf %10, %9 : vector<16x128xf32>
    %cst_5 = arith.constant 0.451862752 : f32
    %12 = vector.broadcast %cst_5 : f32 to vector<16x128xf32>
    %13 = arith.mulf %12, %0 : vector<16x128xf32>
    %14 = arith.addf %11, %13 : vector<16x128xf32>
    %c1_i32_6 = arith.constant 1 : i32
    %15 = tpu.dynamic_rotate %14 by %c1_i32_6 dim 1 : vector<16x128xf32>, i32 -> vector<16x128xf32>
    %c127_i32 = arith.constant 127 : i32
    %16 = tpu.dynamic_rotate %14 by %c127_i32 dim 1 : vector<16x128xf32>, i32 -> vector<16x128xf32>
    %17 = arith.addf %15, %16 : vector<16x128xf32>
    %18 = arith.subf %16, %15 : vector<16x128xf32>
    %19 = vector.broadcast %2 : vector<1x128xf32> to vector<16x128xf32>
    %20 = arith.mulf %18, %19 : vector<16x128xf32>
    %21 = arith.addf %17, %20 : vector<16x128xf32>
    %cst_7 = arith.constant 0.274068624 : f32
    %22 = vector.broadcast %cst_7 : f32 to vector<16x128xf32>
    %23 = arith.mulf %22, %21 : vector<16x128xf32>
    %cst_8 = arith.constant 0.451862752 : f32
    %24 = vector.broadcast %cst_8 : f32 to vector<16x128xf32>
    %25 = arith.mulf %24, %14 : vector<16x128xf32>
    %26 = arith.addf %23, %25 : vector<16x128xf32>
    %c0_9 = arith.constant 0 : index
    %c0_10 = arith.constant 0 : index
    %27 = vector.load %arg4[%c0_9, %c0_10] : memref<16x128xf32, #tpu.memory_space<vmem>>, vector<16x128xf32>
    tpu.vector_store %arg4[%c0_9, %c0_10], %26 {strides = array<i32>} : memref<16x128xf32, #tpu.memory_space<vmem>>, vector<16x128xf32>,
    return
  }
  func.func @transform_0(%arg0: i32) -> (i32, i32) {
    %c0_i32 = arith.constant 0 : i32
    %c0_i32_0 = arith.constant 0 : i32
    %c0_i32_1 = arith.constant 0 : i32
    return %c0_i32, %c0_i32_0 : i32, i32
  }
  func.func @transform_1(%arg0: i32) -> (i32, i32) {
    %c0_i32 = arith.constant 0 : i32
    %c0_i32_0 = arith.constant 0 : i32
    %c0_i32_1 = arith.constant 0 : i32
    return %c0_i32, %c0_i32_0 : i32, i32
  }
  func.func @transform_2(%arg0: i32) -> (i32, i32) {
    %c0_i32 = arith.constant 0 : i32
    %c0_i32_0 = arith.constant 0 : i32
    return %arg0, %c0_i32 : i32, i32
  }
  func.func @transform_3(%arg0: i32) -> (i32, i32) {
    %c0_i32 = arith.constant 0 : i32
    %c0_i32_0 = arith.constant 0 : i32
    return %arg0, %c0_i32 : i32, i32
  }
}

</mosaic_0001>

<bundles_post_ra>
// kernel: a_call__.1
= control target key start
LH: loop header
LB: loop body
LE: loop exit
PB: predicated region body
PF: predicated region fallthrough
CT: control target
= control target key end

     0   :  { %v94_v0 = vmov 0   ;;  %v21_v3 = vlaneseq  ;;  %s138_s0 = inlined_call_operand.vmem [shape: f32[16,1], index: 0, kind: input, shape index: {}]   ;;  %s139_s2 = inlined_call_operand.vmem [shape: f32[16,128], index: 2, kind: input, shape index: {}]   ;;  %s140_s1 = inlined_call_operand.vmem [shape: f32[1,128], index: 1, kind: input, shape index: {}]   ;;  %s141_s3 = inlined_call_operand.vmem [shape: f32[16,128], index: 3, kind: output, shape index: {}]  }
   0x1   :  { %93 = vset.pattern.permute.xlu0 %v94_v0  ;;  %v16_v1 = vld [vmem:[%s138_s0] sm:$0xff]  ;;  %v17_v2 = vld [vmem:[%s138_s0 + $0x8] sm:$0xff]  ;;  %s95_s0 = smov 127  }
   0x2   :  { %37 = vperm.xlu0 %93, %v16_v1   ;;  %v14_v4 = vld [vmem:[%s139_s2] sm:$0xff]  ;;  %v15_v5 = vld [vmem:[%s139_s2 + $0x8] sm:$0xff]  ;;  %v22_v6 = vshrl.u32 %v21_v3, 7  ;;  %s96_s2 = smov 1  }
   0x3   :  { %v19_v7 = vrot.slane %v14_v4, 7  ;;  %v20_v8 = vrot.slane %v15_v5, 7  ;;  %v26_v9 = vrot.slane %v14_v4, 1  ;;  %v27_v10 = vrot.slane %v15_v5, 1  ;;  %v89_v32 = vld [vmem:[%s140_s1] ss:$0 sm:$0xff] }
   0x4   :  { %vm23_vm0 = vcmp.lt.s32.totalorder %v22_v6, 1  ;;  %vm28_vm1 = vcmp.lt.s32.totalorder %v22_v6, 7  ;;  %v51_v22 = vmul.f32 0.45186275, %v14_v4  ;;  %v52_v28 = vmul.f32 0.45186275, %v15_v5 }
   0x5   :  { %v25_v11 = vsel %vm23_vm0, %v20_v8, %v19_v7  ;;  %v29_v12 = vsel %vm28_vm1, %v26_v9, %v27_v10  ;;  %v24_v14 = vsel %vm23_vm0, %v19_v7, %v20_v8  ;;  %v30_v15 = vsel %vm28_vm1, %v27_v10, %v26_v9 }
   0x6   :  { %42 = vperm.xlu0 %93, %v17_v2   ;;  %v33_v13 = vsub.f32 %v29_v12, %v25_v11  ;;  %v31_v16 = vadd.f32 %v29_v12, %v25_v11  ;;  %v34_v19 = vsub.f32 %v30_v15, %v24_v14  ;;  %v32_v21 = vadd.f32 %v30_v15, %v24_v14 }
  0x81   :  { %v38_v17 = vpop.permute.xlu0 %37 }
  0x82   :  { %v45_v18 = vmul.f32 %v38_v17, %v33_v13 }
  0x84   :  { %v47_v20 = vadd.f32 %v45_v18, %v31_v16 }
  0x85   :  { %v43_v23 = vpop.permute.xlu0 %42 }
  0x86   :  { %v49_v24 = vmul.f32 0.27406862, %v47_v20  ;;  %v46_v25 = vmul.f32 %v43_v23, %v34_v19 }
  0x88   :  { %v48_v26 = vadd.f32 %v46_v25, %v32_v21  ;;  %v53_v27 = vadd.f32 %v51_v22, %v49_v24 }
  0x8a   :  { %v50_v29 = vmul.f32 0.27406862, %v48_v26  ;;  %59 = vrot.lane.b32.xlu0 %v53_v27, %s95_s0  ;;  %55 = vrot.lane.b32.xlu1 %v53_v27, %s96_s2  ;;  %v79_v39 = vmul.f32 0.45186275, %v53_v27 }
  0x8c   :  { %v54_v30 = vadd.f32 %v52_v28, %v50_v29 }
  0x8e   :  { %57 = vrot.lane.b32.xlu1 %v54_v30, %s96_s2  ;;  %v80_v48 = vmul.f32 0.45186275, %v54_v30 }
  0x92   :  { %61 = vrot.lane.b32.xlu1 %v54_v30, %s95_s0 }
  0xfc   :  { %v56_v31 = vpop.permute.xlu1 %55  ;;  %v60_v33 = vpop.permute.xlu0 %59 }
  0xfd   :  { %v65_v34 = vsub.f32 %v60_v33, %v56_v31  ;;  %v63_v35 = vadd.f32 %v60_v33, %v56_v31 }
  0xff   :  { %v73_v36 = vmul.f32 %v89_v32, %v65_v34 }
 0x100   :  { %v58_v37 = vpop.permute.xlu1 %57 }
 0x101   :  { %v75_v38 = vadd.f32 %v73_v36, %v63_v35 }
 0x103   :  { %v77_v40 = vmul.f32 0.27406862, %v75_v38 }
 0x104   :  { %v62_v41 = vpop.permute.xlu1 %61 }
 0x105   :  { %v81_v42 = vadd.f32 %v79_v39, %v77_v40  ;;  %v66_v43 = vsub.f32 %v62_v41, %v58_v37  ;;  %v64_v44 = vadd.f32 %v62_v41, %v58_v37 }
 0x107   :  { %83 = vst [vmem:[%s141_s3] sm:$0xff] %v81_v42  ;;  %v74_v45 = vmul.f32 %v89_v32, %v66_v43 }
 0x109   :  { %v76_v46 = vadd.f32 %v74_v45, %v64_v44 }
 0x10b   :  { %v78_v47 = vmul.f32 0.27406862, %v76_v46 }
 0x10d   :  { %v82_v49 = vadd.f32 %v80_v48, %v78_v47 }
 0x10f   :  { %84 = vst [vmem:[%s141_s3 + $0x8] sm:$0xff] %v82_v49 }

</bundles_post_ra>
